<compile_context>
chip_gen: v7x
topology: tpu7x:2x2x1
jax: 0.10.0
libtpu: 0.0.40
codegen_flags: <defaults>
</compile_context>

<pallas_src>
import jax
import jax.numpy as jnp
from jax.experimental import pallas as pl
from jax.experimental.pallas import tpu as pltpu

EPS = 1e-5

# Target x-tile size per grid step (plateau of HBM-roofline measurements).
_TARGET_TILE_BYTES = 8 * 1024 * 1024


def _make_kernel(true_h, h_pad, eps):
    """Build a LayerNorm kernel specialized for (true_h, h_pad)."""
    inv_h = 1.0 / float(true_h)
    need_mask = h_pad != true_h

    def kernel(w_ref, b_ref, x_ref, o_ref):
        # x_ref: (tS, H_pad); w_ref/b_ref: (1, H_pad) per-batch affine params.
        x = x_ref[...].astype(jnp.float32)

        # Padded lanes (if any) are zero in the input, so the plain sum / true_h
        # is the correct mean.
        mean = jnp.sum(x, axis=-1, keepdims=True) * inv_h
        d = x - mean
        if need_mask:
            # Zero the centered values in padded lanes so the variance and the
            # output (w/b are zero-padded too) stay exact.
            lane = jax.lax.broadcasted_iota(jnp.int32, x.shape, dimension=x.ndim - 1)
            d = jnp.where(lane < true_h, d, 0.0)

        # Two-pass variance (matches torch.mean((x-mean)**2)); clamp guards
        # against tiny negative rounding before rsqrt.
        var = jnp.maximum(jnp.sum(d * d, axis=-1, keepdims=True) * inv_h, 0.0)
        inv = jax.lax.rsqrt(var + eps)

        o_ref[...] = (d * inv * w_ref[...] + b_ref[...]).astype(o_ref.dtype)

    return kernel


def _vmem_budgets():
    """(per-step tile budget, scoped vmem_limit) -- generation aware."""
    try:
        vmem = pltpu.get_tpu_info().vmem_capacity_bytes
    except Exception:  # pragma: no cover - interpret mode / older jax
        vmem = 128 * 1024 * 1024
    if vmem <= 64 * 1024 * 1024:
        # v7x: 64 MiB VMEM per TensorCore -- stay well clear.
        return 14 * 1024 * 1024, 32 * 1024 * 1024
    # v5e / v6e: 128 MiB VMEM -- use the headroom for taller tiles.
    return 48 * 1024 * 1024, 64 * 1024 * 1024


def _pick_tile_s(S, H_pad, in_itemsize, out_itemsize, budget_bytes, sublane):
    """Row tile sized by bytes, counting DMA buffers + in-kernel f32 temps."""
    # Per row of the tile:
    #   2 double-buffered input rows + 2 double-buffered output rows (DMA)
    #   + ~2 f32 rows of in-kernel temporaries (x.astype(f32), d = x - mean).
    bytes_per_row = H_pad * (2 * in_itemsize + 2 * out_itemsize + 2 * 4)
    vmem_rows = max(sublane, budget_bytes // bytes_per_row)
    # Multi-MiB x-tiles amortize the ~0.35us (~600 cycle) per-grid-step cost.
    target_rows = max(sublane, _TARGET_TILE_BYTES // (H_pad * in_itemsize))
    rows = min(vmem_rows, target_rows)

    if S <= rows:
        return S  # full axis is always a legal block size

    rows = max(sublane, (rows // sublane) * sublane)
    # Prefer a tile that divides S so the last step isn't a masked partial tile.
    r = rows
    while r >= sublane:
        if S % r == 0:
            return r
        r -= sublane
    return rows


def conditional_layer_norm(x, cond, params, eps=EPS):
    """x: (B, S, H), cond: (B, C)."""
    B, S, H = x.shape

    # --- conditioning path hoisted to XLA (one batched GEMM per weight) ---
    # PyTorch nn.Linear: y = x @ W.T + b.
    ch = cond @ params["w_hidden"].T + params["b_hidden"]                   # (B, C)
    w = (ch @ params["w_weight"].T + params["gamma"]).astype(jnp.float32)   # (B, H)
    bia = (ch @ params["w_bias"].T + params["beta"]).astype(jnp.float32)    # (B, H)

    # --- lane-dense last dim: pad H to a multiple of 128 if necessary ---
    H_pad = ((H + 127) // 128) * 128
    x_in = x
    if H_pad != H:
        x_in = jnp.pad(x, ((0, 0), (0, 0), (0, H_pad - H)))
        w = jnp.pad(w, ((0, 0), (0, H_pad - H)))
        bia = jnp.pad(bia, ((0, 0), (0, H_pad - H)))
    w = w.reshape(B, 1, H_pad)
    bia = bia.reshape(B, 1, H_pad)

    tile_budget, vmem_limit = _vmem_budgets()
    sublane = {4: 8, 2: 16, 1: 32}.get(x.dtype.itemsize, 8)
    tS = _pick_tile_s(S, H_pad, x_in.dtype.itemsize, x.dtype.itemsize,
                      tile_budget, sublane)
    n_s = pl.cdiv(S, tS)

    kernel = _make_kernel(H, H_pad, eps)

    out = pl.pallas_call(
        kernel,
        out_shape=jax.ShapeDtypeStruct((B, S, H_pad), x.dtype),
        grid=(B, n_s),
        in_specs=[
            # Per-batch scale / shift, resident in VMEM across the S axis.
            pl.BlockSpec((pl.Squeezed(), 1, H_pad), lambda b, s: (b, 0, 0)),
            pl.BlockSpec((pl.Squeezed(), 1, H_pad), lambda b, s: (b, 0, 0)),
            # x tile: leading batch dim squeezed -> kernel sees (tS, H_pad).
            pl.BlockSpec((pl.Squeezed(), tS, H_pad), lambda b, s: (b, s, 0)),
        ],
        out_specs=pl.BlockSpec((pl.Squeezed(), tS, H_pad), lambda b, s: (b, s, 0)),
        compiler_params=pltpu.CompilerParams(
            dimension_semantics=("parallel", "parallel"),
            vmem_limit_bytes=vmem_limit,
        ),
    )(w, bia, x_in)

    if H_pad != H:
        out = out[:, :, :H]
    return out


if __name__ == "__main__":
    B, S, H, C = 2, 8, 32, 16  # normalized_shape=(H,), conditional_shape=C

    key = jax.random.PRNGKey(0)
    k_x, k_c, k_wh, k_bh, k_ww, k_wb = jax.random.split(key, 6)

    x = jax.random.normal(k_x, (B, S, H), jnp.float32)
    cond = jax.random.normal(k_c, (B, C), jnp.float32)

    # Deterministic synthetic parameters (shapes per the module's __init__).
    # reset_parameters() would zero weight_layer/bias_layer; we use small
    # nonzero values so the conditional path is actually exercised.
    params = dict(
        w_hidden=0.10 * jax.random.normal(k_wh, (C, C), jnp.float32),  # hidden_dense.weight
        b_hidden=0.10 * jax.random.normal(k_bh, (C,), jnp.float32),    # hidden_dense.bias
        w_weight=0.05 * jax.random.normal(k_ww, (H, C), jnp.float32),  # weight_layer.weight
        w_bias=0.05 * jax.random.normal(k_wb, (H, C), jnp.float32),    # bias_layer.weight
        gamma=jnp.ones((H,), jnp.float32),                             # self.weight
        beta=jnp.zeros((H,), jnp.float32),                             # self.bias
    )

    out = jax.block_until_ready(conditional_layer_norm(x, cond, params))

    # Pure-JAX reference (mirrors the PyTorch forward exactly).
    ch = cond @ params["w_hidden"].T + params["b_hidden"]
    w_ref = ch @ params["w_weight"].T + params["gamma"]
    b_ref = ch @ params["w_bias"].T + params["beta"]
    mean = x.mean(-1, keepdims=True)
    var = ((x - mean) ** 2).mean(-1, keepdims=True)
    ref = (x - mean) / jnp.sqrt(var + EPS) * w_ref[:, None, :] + b_ref[:, None, :]

    assert out.shape == (B, S, H) and out.dtype == jnp.float32
    assert jnp.allclose(out, ref, atol=1e-4, rtol=1e-4), "mismatch vs reference"
    print("KERNEL_OK")
</pallas_src>

<mosaic_0001>
module attributes {stable_mosaic.version = 11 : i64} {
  func.func @kernel(%arg0: i32, %arg1: i32, %arg2: memref<1x1x128xf32, #tpu.memory_space<vmem>>, %arg3: memref<1x1x128xf32, #tpu.memory_space<vmem>>, %arg4: memref<1x8x128xf32, #tpu.memory_space<vmem>>, %arg5: memref<1x8x128xf32, #tpu.memory_space<vmem>>) attributes {dimension_semantics = [#tpu.dimension_semantics<parallel>, #tpu.dimension_semantics<parallel>], iteration_bounds = array<i64: 2, 1>, scalar_prefetch = 0 : i64, scratch_operands = 0 : i64, tpu.core_type = #tpu.core_type<tc>, window_params = [{transform_indices = @transform_0, window_bounds = array<i64: 1, 1, 128>}, {transform_indices = @transform_1, window_bounds = array<i64: 1, 1, 128>}, {transform_indices = @transform_2, window_bounds = array<i64: 1, 8, 128>}, {transform_indices = @transform_3, window_bounds = array<i64: 1, 8, 128>}]} {
    %c0 = arith.constant 0 : index
    %c0_0 = arith.constant 0 : index
    %c0_1 = arith.constant 0 : index
    %0 = vector.load %arg4[%c0, %c0_0, %c0_1] : memref<1x8x128xf32, #tpu.memory_space<vmem>>, vector<1x8x128xf32>
    %1 = vector.shape_cast %0 : vector<1x8x128xf32> to vector<8x128xf32>
    %cst = arith.constant dense<0.000000e+00> : vector<8xf32>
    %2 = vector.multi_reduction <add>, %1, %cst [1] : vector<8x128xf32> to vector<8xf32>
    %3 = vector.shape_cast %2 : vector<8xf32> to vector<8x1xf32>
    %cst_2 = arith.constant 3.125000e-02 : f32
    %4 = vector.broadcast %cst_2 : f32 to vector<8x1xf32>
    %5 = arith.mulf %3, %4 : vector<8x1xf32>
    %6 = vector.broadcast %5 : vector<8x1xf32> to vector<8x128xf32>
    %7 = arith.subf %1, %6 : vector<8x128xf32>
    %8 = tpu.iota {dimensions = array<i32: 1>} : vector<8x128xi32>
    %c32_i32 = arith.constant 32 : i32
    %9 = vector.broadcast %c32_i32 : i32 to vector<8x128xi32>
    %10 = arith.cmpi slt, %8, %9 : vector<8x128xi32>
    %cst_3 = arith.constant 0.000000e+00 : f32
    %11 = vector.broadcast %cst_3 : f32 to vector<8x128xf32>
    %12 = arith.select %10, %7, %11 : vector<8x128xi1>, vector<8x128xf32>
    %13 = arith.mulf %12, %12 : vector<8x128xf32>
    %cst_4 = arith.constant dense<0.000000e+00> : vector<8xf32>
    %14 = vector.multi_reduction <add>, %13, %cst_4 [1] : vector<8x128xf32> to vector<8xf32>
    %15 = vector.shape_cast %14 : vector<8xf32> to vector<8x1xf32>
    %cst_5 = arith.constant 3.125000e-02 : f32
    %16 = vector.broadcast %cst_5 : f32 to vector<8x1xf32>
    %17 = arith.mulf %15, %16 : vector<8x1xf32>
    %cst_6 = arith.constant 0.000000e+00 : f32
    %18 = vector.broadcast %cst_6 : f32 to vector<8x1xf32>
    %19 = arith.maximumf %17, %18 : vector<8x1xf32>
    %cst_7 = arith.constant 9.99999974E-6 : f32
    %20 = vector.broadcast %cst_7 : f32 to vector<8x1xf32>
    %21 = arith.addf %19, %20 : vector<8x1xf32>
    %22 = math.rsqrt %21 : vector<8x1xf32>
    %23 = vector.broadcast %22 : vector<8x1xf32> to vector<8x128xf32>
    %24 = arith.mulf %12, %23 : vector<8x128xf32>
    %c0_8 = arith.constant 0 : index
    %c0_9 = arith.constant 0 : index
    %c0_10 = arith.constant 0 : index
    %25 = vector.load %arg2[%c0_8, %c0_9, %c0_10] : memref<1x1x128xf32, #tpu.memory_space<vmem>>, vector<1x1x128xf32>
    %26 = vector.shape_cast %25 : vector<1x1x128xf32> to vector<1x128xf32>
    %27 = vector.broadcast %26 : vector<1x128xf32> to vector<8x128xf32>
    %28 = arith.mulf %24, %27 : vector<8x128xf32>
    %c0_11 = arith.constant 0 : index
    %c0_12 = arith.constant 0 : index
    %c0_13 = arith.constant 0 : index
    %29 = vector.load %arg3[%c0_11, %c0_12, %c0_13] : memref<1x1x128xf32, #tpu.memory_space<vmem>>, vector<1x1x128xf32>
    %30 = vector.shape_cast %29 : vector<1x1x128xf32> to vector<1x128xf32>
    %31 = vector.broadcast %30 : vector<1x128xf32> to vector<8x128xf32>
    %32 = arith.addf %28, %31 : vector<8x128xf32>
    %c0_14 = arith.constant 0 : index
    %c0_15 = arith.constant 0 : index
    %c0_16 = arith.constant 0 : index
    %33 = vector.load %arg5[%c0_14, %c0_15, %c0_16] : memref<1x8x128xf32, #tpu.memory_space<vmem>>, vector<1x8x128xf32>
    %34 = vector.shape_cast %33 : vector<1x8x128xf32> to vector<8x128xf32>
    %35 = vector.shape_cast %32 : vector<8x128xf32> to vector<1x8x128xf32>
    tpu.vector_store %arg5[%c0_14, %c0_15, %c0_16], %35 {strides = array<i32>} : memref<1x8x128xf32, #tpu.memory_space<vmem>>, vector<1x8x128xf32>,
    return
  }
  func.func @transform_0(%arg0: i32, %arg1: i32) -> (i32, i32, i32) {
    %c0_i32 = arith.constant 0 : i32
    %c0_i32_0 = arith.constant 0 : i32
    %c0_i32_1 = arith.constant 0 : i32
    return %arg0, %c0_i32, %c0_i32_0 : i32, i32, i32
  }
  func.func @transform_1(%arg0: i32, %arg1: i32) -> (i32, i32, i32) {
    %c0_i32 = arith.constant 0 : i32
    %c0_i32_0 = arith.constant 0 : i32
    %c0_i32_1 = arith.constant 0 : i32
    return %arg0, %c0_i32, %c0_i32_0 : i32, i32, i32
  }
  func.func @transform_2(%arg0: i32, %arg1: i32) -> (i32, i32, i32) {
    %c0_i32 = arith.constant 0 : i32
    %c0_i32_0 = arith.constant 0 : i32
    return %arg0, %arg1, %c0_i32 : i32, i32, i32
  }
  func.func @transform_3(%arg0: i32, %arg1: i32) -> (i32, i32, i32) {
    %c0_i32 = arith.constant 0 : i32
    %c0_i32_0 = arith.constant 0 : i32
    return %arg0, %arg1, %c0_i32 : i32, i32, i32
  }
}

</mosaic_0001>

<bundles_post_ra>
// kernel: tpu_custom_call.1
= control target key start
LH: loop header
LB: loop body
LE: loop exit
PB: predicated region body
PF: predicated region fallthrough
CT: control target
= control target key end

     0   :  { %s984_s0 = inlined_call_operand.hbm [shape: f32[2,1,128], index: 0, kind: input, shape index: {}]   ;;  %s985_s1 = inlined_call_operand.hbm [shape: f32[2,1,128], index: 1, kind: input, shape index: {}]   ;;  %s986_s2 = inlined_call_operand.hbm [shape: f32[2,8,128], index: 2, kind: input, shape index: {}]   ;;  %s987_s3 = inlined_call_operand.hbm [shape: f32[2,8,128], index: 3, kind: output, shape index: {}]  }
   0x1   :  { %991 = sst [smem:[#allocation12_spill]] %s985_s1 }
   0x2   :  { %8 = vsyncpa [#allocation3], 0 }
   0x3   :  { %10 = vsyncpa [#allocation3 + $0x1], 0 }
   0x4   :  { %11 = vsyncpa [#allocation6], 0 }
   0x5   :  { %13 = vsyncpa [#allocation6 + $0x1], 0 }
   0x6   :  { %14 = vsyncpa [#allocation4], 0 }
   0x7   :  { %16 = vsyncpa [#allocation4 + $0x1], 0  ;;  %s727_s12 = smov 0   ;;  %s729_s13 = smov 0  }
   0x8   :  { %s731_s14 = smov 0   ;;  %s733_s15 = smov 0  }
   0x9   :  { %s735_s16 = smov 0   ;;  %s737_s17 = smov 0  }
   0xa LB: > { %s758_s18 = sadd.s32 4294967295, %s701_s17   ;;  %s435_s19 = sadd.s32 4294967294, %s701_s17   ;;  %s701_s17 = sphi %s737_s17, %s22_s17   ;;  %s697_s16 = sphi %s735_s16, %s1011_s16   ;;  %s693_s15 = sphi %s733_s15, %s1010_s15   ;;  %s689_s14 = sphi %s731_s14, %s1009_s14   ;;  %s685_s13 = sphi %s729_s13, %s1008_s13   ;;  %s681_s12 = sphi %s727_s12, %s1007_s12  }
   0xb   : > { %s34_s20 = sadd.s32 1, %s697_s16  ;;  %s41_s21 = sadd.s32 1, %s689_s14 }
   0xc   : > { %p36_p0 = scmp.ge.s32.totalorder %s34_s20, 2  ;;  %p48_p1 = scmp.ne.s32.totalorder %s689_s14, %s685_s13 }
   0xd   : > { %p49_p2 = scmp.eq.s32.totalorder %s701_s17, 0  ;;  %p54_p3 = scmp.ne.s32.totalorder %s685_s13, %s681_s12 }
   0xe   : > { %s1013_s20 = smov (%p36_p0, %s34_s20), 0  ;;  %p55_p5 = scmp.eq.s32.totalorder %s758_s18, 0 }
   0xf   : > { %p770_p4 = por %p49_p2, %p48_p1  ;;  %s38_s23 = ssub.s32 %s697_s16, %s1013_s20 }
  0x10   : > { %p134_p6 = scmp.eq.s32.totalorder %s758_s18, 1  ;;  %p39_p7 = scmp.eq.s32.totalorder %s38_s23, 0 }
  0x11   : > { %p778_p8 = por %p55_p5, %p54_p3  ;;  %p140_p10 = scmp.eq.s32.totalorder %s435_s19, 1 }
  0x12   : > { %p782_p9 = por %p134_p6, %p48_p1  ;;  %p473_p13 = scmp.lt.s32.totalorder %s701_s17, 2 }
  0x13   : > { %s993_s24 = scalar_select %p778_p8, 1, 0 }
  0x14   : > { %s994_s25 = scalar_select %p782_p9, 1, 0 }
  0x15   : > { %s787_s26 = scalar_select %p39_p7, %s689_s14, %s41_s21  }
  0x16   : > { %p789_p11 = por %p140_p10, %p54_p3  ;;  %s796_s28 = sand.u32 1, %s689_s14  }
  0x17   : > { %s438_s29 = sshll.u32 %s697_s16, 4  ;;  %s177_s30 = sand.u32 1, %s701_s17  }
  0x18   : > { %s995_s27 = scalar_select %p789_p11, 1, 0 }
  0x19   : > { %p802_p0 = pnand %p473_p13, %p770_p4  ;;  %s997_s1 = sld [smem:[#allocation12_spill]] }
  0x1a   : > { %s180_s8 = scalar_lea.vmem [#allocation5], %s796_s28  ;;  %s817_s10 = scalar_lea.sflag [#allocation6], %s177_s30 }
  0x1b   : > { %s996_s4 = scalar_select %p802_p0, 1, 0 }
  0x1c   : > { %s187_s9 = sshll.u32 %s180_s8, 4  ;;  %p823_p3 = pneg %p802_p0  ;;  %s814_s9 = int_to_ptr.vmem [resolvable:$true] %s187_s9 }
  0x1f   : > { %s811_s7 = scalar_lea.hbm %s997_s1, %s438_s29  ;;  %s530_s23 = scalar_lea.hbm %s997_s1, 32 }
  0x20   : > { %s525_s11 = scalar_lea.hbm %s811_s7, 16  ;;  %p531_p6 = scmp.lt.u32.totalorder %s811_s7, %s997_s1 }
  0x21   : > { %p526_p2 = scmp.ne.s32.totalorder %s811_s7, %s525_s11  ;;  %p532_p7 = scmp.lt.u32.totalorder %s530_s23, %s525_s11 }
  0x22   : > { %p534_p13 = scmp.lt.u32.totalorder %s525_s11, %s811_s7 }
  0x23   : > { %p528_p4 = pnand %p823_p3, %p526_p2  ;;  %p533_p10 = por %p532_p7, %p531_p6 }
  0x25   : > { %p529_p5 = pneg %p528_p4  ;;  %p535_p12 = por %p534_p13, %p533_p10 }
  0x27   : > { %p536_p1 = pnand %p535_p12, %p529_p5 }
  0x29   : > { %539 = shalt.err (!%p536_p1)
}
  0x2a   : > { %s540_s30 = scalar_lea.vmem %s814_s9, 16  ;;  %s703_s8 = smov [#allocation5]  }
  0x2b   : > { %p541_p2 = scmp.ne.s32.totalorder %s814_s9, %s540_s30  ;;  %s545_s21 = sshll.u32 %s703_s8, 4  ;;  %s546_s21 = int_to_ptr.vmem [resolvable:$false] %s545_s21 }
  0x2c   : > { %s547_s22 = scalar_lea.vmem %s546_s21, 32  ;;  %p548_p9 = scmp.lt.s32.totalorder %s814_s9, %s546_s21 }
  0x2d   : > { %p543_p4 = pnand %p541_p2, %p823_p3  ;;  %p549_p8 = scmp.lt.s32.totalorder %s547_s22, %s540_s30 }
  0x2f   : > { %p544_p11 = pneg %p543_p4  ;;  %p550_p6 = por %p549_p8, %p548_p9 }
  0x31   : > { %p551_p7 = pnand %p550_p6, %p544_p11 }
  0x33   : > { %554 = shalt.err (!%p551_p7)
}
  0x34   : > { %465 = dma.hbm_to_vmem [thread:$0]  (!%p802_p0), %s811_s7, 16, %s814_s9, %s817_s10  }
  0x35   : > { %p211_p12 = scmp.lt.s32.totalorder %s701_s17, 3  ;;  %p999_p1 = scmp.ge.s32.totalorder %s701_s17, 1 }
  0x36   : > { %s859_s6 = scalar_lea.hbm %s984_s0, %s438_s29  ;;  %s163_s30 = scalar_lea.vmem [#allocation2], %s796_s28 }
  0x37   : > { %p850_p5 = pnand %p999_p1, %p211_p12  ;;  %s170_s8 = sshll.u32 %s163_s30, 4  ;;  %s862_s8 = int_to_ptr.vmem [resolvable:$true] %s170_s8 }
  0x38   : > { %s440_s7 = sshll.u32 %s796_s28, 3  ;;  %s161_s9 = scalar_lea.sflag [#allocation3], %s796_s28 }
  0x39   : > { %s1000_s11 = scalar_select %p850_p5, 1, 0 }
  0x3a   : > { %s555_s21 = scalar_lea.hbm %s859_s6, 16  ;;  %s560_s29 = scalar_lea.hbm %s984_s0, 32 }
  0x3b   : > { %p556_p8 = scmp.ne.s32.totalorder %s859_s6, %s555_s21  ;;  %p561_p10 = scmp.lt.u32.totalorder %s859_s6, %s984_s0 }
  0x3c   : > { %p562_p13 = scmp.lt.u32.totalorder %s560_s29, %s555_s21  ;;  %p564_p4 = scmp.lt.u32.totalorder %s555_s21, %s859_s6 }
  0x3d   : > { %p558_p9 = pnand %p556_p8, %p823_p3 }
  0x3e   : > { %p563_p2 = por %p562_p13, %p561_p10 }
  0x3f   : > { %p559_p11 = pneg %p558_p9 }
  0x40   : > { %p565_p6 = por %p564_p4, %p563_p2 }
  0x42   : > { %p566_p7 = pnand %p565_p6, %p559_p11 }
  0x44   : > { %569 = shalt.err (!%p566_p7)
}
  0x45   : > { %s570_s30 = scalar_lea.vmem %s862_s8, 16  ;;  %s704_s1 = smov [#allocation2]  }
  0x46   : > { %p571_p12 = scmp.ne.s32.totalorder %s862_s8, %s570_s30  ;;  %s575_s22 = sshll.u32 %s704_s1, 4  ;;  %s576_s22 = int_to_ptr.vmem [resolvable:$false] %s575_s22 }
  0x47   : > { %s577_s23 = scalar_lea.vmem %s576_s22, 32  ;;  %p578_p9 = scmp.lt.s32.totalorder %s862_s8, %s576_s22 }
  0x48   : > { %p573_p1 = pnand %p571_p12, %p823_p3  ;;  %p579_p5 = scmp.lt.s32.totalorder %s577_s23, %s570_s30 }
  0x4a   : > { %p574_p8 = pneg %p573_p1  ;;  %p580_p10 = por %p579_p5, %p578_p9 }
  0x4c   : > { %p581_p13 = pnand %p580_p10, %p574_p8 }
  0x4e   : > { %584 = shalt.err (!%p581_p13)
}
  0x4f   : > { %462 = dma.hbm_to_vmem [thread:$0]  (!%p802_p0), %s859_s6, 16, %s862_s8, %s161_s9  }
  0x50   : > { %s441_s21 = sshll.u32 %s697_s16, 7  ;;  %s198_s30 = scalar_lea.vmem [#allocation7], %s440_s7 }
  0x51   : > { %s891_s1 = scalar_lea.hbm %s986_s2, %s441_s21  ;;  %s206_s22 = sshll.u32 %s198_s30, 4  ;;  %s207_s22 = int_to_ptr.vmem [resolvable:$true] %s206_s22 }
  0x52   : > { %s585_s23 = scalar_lea.hbm %s891_s1, 128  ;;  %s590_s9 = scalar_lea.hbm %s986_s2, 256 }
  0x53   : > { %p586_p5 = scmp.ne.s32.totalorder %s891_s1, %s585_s23  ;;  %p591_p4 = scmp.lt.u32.totalorder %s891_s1, %s986_s2 }
  0x54   : > { %p592_p6 = scmp.lt.u32.totalorder %s590_s9, %s585_s23  ;;  %p594_p12 = scmp.lt.u32.totalorder %s585_s23, %s891_s1 }
  0x55   : > { %p588_p11 = pnand %p586_p5, %p823_p3 }
  0x56   : > { %p593_p7 = por %p592_p6, %p591_p4 }
  0x57   : > { %p589_p2 = pneg %p588_p11 }
  0x58   : > { %p595_p1 = por %p594_p12, %p593_p7 }
  0x5a   : > { %p596_p8 = pnand %p595_p1, %p589_p2 }
  0x5c   : > { %599 = shalt.err (!%p596_p8)
}
  0x5d   : > { %s600_s28 = scalar_lea.vmem %s207_s22, 128  ;;  %s705_s7 = smov [#allocation7]  }
  0x5e   : > { %p601_p9 = scmp.ne.s32.totalorder %s207_s22, %s600_s28  ;;  %s605_s5 = sshll.u32 %s705_s7, 4  ;;  %s606_s5 = int_to_ptr.vmem [resolvable:$false] %s605_s5 }
  0x5f   : > { %s607_s30 = scalar_lea.vmem %s606_s5, 256  ;;  %p608_p5 = scmp.lt.s32.totalorder %s207_s22, %s606_s5 }
  0x60   : > { %p603_p10 = pnand %p601_p9, %p823_p3  ;;  %p609_p11 = scmp.lt.s32.totalorder %s607_s30, %s600_s28 }
  0x62   : > { %p604_p13 = pneg %p603_p10  ;;  %p610_p0 = por %p609_p11, %p608_p5 }
  0x64   : > { %p611_p4 = pnand %p610_p0, %p604_p13 }
  0x66   : > { %614 = shalt.err (!%p611_p4)
}
  0x67   : > { %p1001_p6 = scmp.ne.s32.totalorder %s996_s4, 0  ;;  %p1002_p2 = scmp.ne.s32.totalorder %s1000_s11, 0 }
  0x68   : > { %s916_s19 = sand.u32 (!%p1002_p2), 1, %s685_s13   ;;  %p1003_p3 = scmp.ne.s32.totalorder (!%p1002_p2), %s993_s24, 0 }
  0x69   : > { %468 = dma.hbm_to_vmem [thread:$0]  (!%p1001_p6), %s891_s1, 128, %s207_s22, %s817_s10  }
  0x6a   : > { %215 = sbr.rel (%p1002_p2) target bundleno = 448 (0x1c0), region = 32  ;;  %s218_s23 = scalar_lea.sflag (!%p1002_p2), [#allocation3], %s916_s19 }
  0x6b   : > { %s220_s6 = scalar_lea.vmem (!%p1002_p2), [#allocation2], %s916_s19 }
  0x71   : > { %668 = dma.done.wait (%p1003_p3), %s218_s23, 16  }
  0x72   : > { %670 = vsyncadd (%p1003_p3), %s218_s23, 4294967280  ;;  %s225_s4 = sand.u32 1, %s758_s18   ;;  %s228_s11 = scalar_lea.vmem [#allocation5], %s916_s19 }
  0x73   : > { %s226_s10 = scalar_lea.sflag [#allocation6], %s225_s4 }
  0x74   : > { %672 = dma.done.wait (%p1003_p3), %s226_s10, 144  }
  0x75   : > { %674 = vsyncadd (%p1003_p3), %s226_s10, 4294967152  ;;  %s443_s1 = sshll.u32 %s916_s19, 3  ;;  %v273_v1 = vlaneseq  ;;  %v445_v13 = vld [vmem:[%s220_s6] ss:$0 sm:$0xff]  ;;  %s448_s8 = sshll.u32 %s693_s15, 7 }
  0x76   : > { %s237_s22 = scalar_lea.vmem [#allocation7], %s443_s1  ;;  %s267_s18 = scalar_lea.vmem [#allocation8], %s443_s1  ;;  %v446_v15 = vld [vmem:[%s228_s11] ss:$0 sm:$0xff] }
  0x77   : > { %v268_v0 = vld [vmem:[%s237_s22] sm:$0xff]  ;;  %v274_v2 = vand.u32 127, %v273_v1  ;;  %s317_s24 = sshll.u32 %s267_s18, 4  ;;  %s937_s21 = scalar_lea.hbm %s987_s3, %s448_s8  ;;  %s932_s24 = int_to_ptr.vmem [resolvable:$true] %s317_s24 }
  0x78   : > { %269 = vadd.xlane.f32.xlu0 %v268_v0  ;;  %s303_s28 = scalar_lea.sflag [#allocation4], %s916_s19  ;;  %s615_s7 = scalar_lea.vmem %s932_s24, 128 }
  0x79   : > { %vm275_vm0 = vcmp.lt.s32.totalorder %v274_v2, 32  ;;  %p616_p0 = scmp.ne.s32.totalorder %s932_s24, %s615_s7  ;;  %p1004_p7 = scmp.ne.s32.totalorder %s994_s25, 0 }
  0x7a   : > { %s706_s15 = smov [#allocation8]  }
  0x7b   : > { %p617_p12 = pnand %p616_p0, %p1004_p7  ;;  %s619_s5 = sshll.u32 %s706_s15, 4  ;;  %s620_s5 = int_to_ptr.vmem [resolvable:$false] %s619_s5 }
  0x7c   : > { %s621_s30 = scalar_lea.vmem %s620_s5, 256  ;;  %p622_p8 = scmp.lt.s32.totalorder %s932_s24, %s620_s5 }
  0x7d   : > { %p618_p1 = pneg %p617_p12  ;;  %p623_p9 = scmp.lt.s32.totalorder %s621_s30, %s615_s7 }
  0x7f   : > { %p624_p10 = por %p623_p9, %p622_p8 }
  0x81   : > { %p625_p13 = pnand %p624_p10, %p618_p1 }
 0x105   : > { %v270_v3 = vpop.xlane.xlu0 %269 }
 0x106   : > { %v271_v4 = vmul.f32 0.03125, %v270_v3 }
 0x108   : > { %v272_v5 = vsub.f32 %v268_v0, %v271_v4 }
 0x10a   : > { %v276_v6 = vsel %vm275_vm0, %v272_v5, 0.0 }
 0x10b   : > { %v277_v7 = vmul.f32 %v276_v6, %v276_v6 }
 0x10d   : > { %278 = vadd.xlane.f32.xlu0 %v277_v7 }
 0x19a   : > { %v279_v8 = vpop.xlane.xlu0 %278 }
 0x19b   : > { %v280_v9 = vmul.f32 0.03125, %v279_v8 }
 0x19d   : > { %v281_v10 = vmax.f32 %v280_v9, 0.0 }
 0x19f   : > { %v282_v11 = vadd.f32 1e-05, %v281_v10 }
 0x1a1   : > { %523 = vrsqrt.f32 %v282_v11 }
 0x1ab   : > { %v524_v12 = vpop.eup %523 }
 0x1ac   : > { %v284_v14 = vmul.f32 %v524_v12, %v276_v6 }
 0x1ae   : > { %v292_v16 = vmul.f32 %v445_v13, %v284_v14 }
 0x1b0   : > { %v300_v17 = vadd.f32 %v446_v15, %v292_v16 }
 0x1b2   : > { %301 = vst [vmem:[%s267_s18] sm:$0xff] %v300_v17 }
 0x1b3   : > { %628 = shalt.err (!%p625_p13)
}
 0x1b4   : > { %s629_s19 = scalar_lea.hbm %s937_s21, 128  ;;  %s633_s4 = scalar_lea.hbm %s987_s3, 256 }
 0x1b5   : > { %p630_p5 = scmp.ne.s32.totalorder %s937_s21, %s629_s19  ;;  %p634_p6 = scmp.lt.u32.totalorder %s937_s21, %s987_s3 }
 0x1b6   : > { %p635_p2 = scmp.lt.u32.totalorder %s633_s4, %s629_s19  ;;  %p637_p0 = scmp.lt.u32.totalorder %s629_s19, %s937_s21 }
 0x1b7   : > { %p631_p11 = pnand %p630_p5, %p1004_p7 }
 0x1b8   : > { %p636_p3 = por %p635_p2, %p634_p6 }
 0x1b9   : > { %p632_p4 = pneg %p631_p11 }
 0x1ba   : > { %p638_p12 = por %p637_p0, %p636_p3 }
 0x1bc   : > { %p639_p1 = pnand %p638_p12, %p632_p4 }
 0x1be   : > { %642 = shalt.err (!%p639_p1)
}
 0x1bf   : > { %457 = dma.vmem_to_hbm [thread:$0]  (%p1004_p7), %s932_s24, 128, %s937_s21, %s303_s28  }
 0x1c0 PF: > { %s329_s1 = sand.u32 1, %s681_s12   ;;  %p1005_p8 = scmp.ne.s32.totalorder %s995_s27, 0 }
 0x1c1   : > { %p1006_p9 = scmp.ge.s32.totalorder %s701_s17, 2  ;;  %s330_s22 = scalar_lea.sflag [#allocation4], %s329_s1 }
 0x1c3   : > { %p470_p10 = pnand %p1006_p9, %p1005_p8 }
 0x1c5   : > { %676 = dma.done.wait (!%p470_p10), %s330_s22, 128  }
 0x1c6   : > { %678 = vsyncadd (!%p470_p10), %s330_s22, 4294967168  ;;  %s22_s17 = sadd.s32 1, %s701_s17   ;;  %s1007_s12 = smov %s685_s13 }
 0x1c7   : > { %p19_p13 = scmp.ge.s32.totalorder %s22_s17, 4   ;;  %s1008_s13 = smov %s689_s14 }
 0x1c8   : > { %s1009_s14 = smov %s787_s26  ;;  %s1010_s15 = smov %s697_s16 }
 0x1c9   : > { %s1011_s16 = smov %s1013_s20  ;;  %21 = sbr.rel (!%p19_p13) target bundleno = 10 (0xa), region = 101 }
 0x1d0   :  { %335 = vsyncpa [#allocation3], 1 }
 0x1d1   :  { %337 = vsyncpa [#allocation3 + $0x1], 1 }
 0x1d2   :  { %338 = vsyncpa [#allocation6], 1 }
 0x1d3   :  { %340 = vsyncpa [#allocation6 + $0x1], 1 }
 0x1d4   :  { %341 = vsyncpa [#allocation4], 1 }
 0x1d5   :  { %343 = vsyncpa [#allocation4 + $0x1], 1 }

</bundles_post_ra>
